<compile_context>
chip_gen: v6e
topology: v6e:2x2x1
jax: 0.10.0
libtpu: 0.0.40
codegen_flags: <defaults>
</compile_context>

<pallas_src>
import jax
import jax.numpy as jnp
from jax.experimental import pallas as pl
from jax.experimental.pallas import tpu as pltpu


def linear_permute_kernel(xt_ref, w_ref, b_ref, o_ref):
    # xt_ref: (Fin, S_tile)  VMEM  -- input tile, S on the lane axis
    # w_ref : (Fout, Fin)    SMEM  -- f32 weight scalars
    # b_ref : (Fout,)        SMEM  -- f32 bias scalars
    # o_ref : (Fout, S_tile) VMEM  -- permuted linear output tile
    Fin = xt_ref.shape[0]
    Fout = o_ref.shape[0]

    # Single full-tile load; accumulate in f32 regardless of input dtype.
    xt = xt_ref[...].astype(jnp.float32)

    # Fin/Fout are tiny -> fully unrolled scalar*vector FMAs on the VPU.
    # No MXU, no cross-lane relayouts: the permute was absorbed into the
    # operand layout (S already on lanes), so each row store is lane-dense.
    for o in range(Fout):
        acc = w_ref[o, 0] * xt[0:1, :]
        for f in range(1, Fin):
            acc = acc + w_ref[o, f] * xt[f:f + 1, :]
        o_ref[o:o + 1, :] = (acc + b_ref[o]).astype(o_ref.dtype)


def _pick_s_tile(S):
    """Largest 128-multiple tile (<=1024) that divides S; else the full S."""
    if S % 128 == 0:
        for cand in (1024, 512, 256, 128):
            if S % cand == 0:
                return cand
    return S


def linear_then_permute(x, w, b):
    """x: (B, S, Fin), w: (Fout, Fin), b: (Fout,) -> (B, Fout, S)."""
    B, S, Fin = x.shape
    Fout = w.shape[0]

    S_tile = _pick_s_tile(S)
    grid = (B, S // S_tile)

    # Layout plumbing: present the input with S on the last (lane) axis so the
    # kernel produces the permuted output directly.  allow_input_fusion on
    # this operand lets XLA fuse the transpose into the Pallas call instead of
    # materializing a second HBM copy of x.
    xt = jnp.transpose(x, (0, 2, 1))  # (B, Fin, S)

    # Keep parameters as f32 scalars in SMEM (sub-32-bit SMEM scalar reads are
    # awkward; f32 accumulation is wanted anyway).
    w32 = w.astype(jnp.float32)
    b32 = b.astype(jnp.float32)

    return pl.pallas_call(
        linear_permute_kernel,
        out_shape=jax.ShapeDtypeStruct((B, Fout, S), x.dtype),
        grid=grid,
        in_specs=[
            # (B squeezed, Fin full, S tiled) -- last two dims are full dims or
            # 128-multiples, satisfying the (8, 128) block constraint.
            pl.BlockSpec((None, Fin, S_tile), lambda bi, si: (bi, 0, si)),
            pl.BlockSpec(memory_space=pltpu.MemorySpace.SMEM),   # weight scalars
            pl.BlockSpec(memory_space=pltpu.MemorySpace.SMEM),   # bias scalars
        ],
        out_specs=pl.BlockSpec((None, Fout, S_tile), lambda bi, si: (bi, 0, si)),
        compiler_params=pltpu.CompilerParams(
            # Both grid axes are independent -> shard across v7x's two TCs.
            dimension_semantics=("parallel", "parallel"),
            # Size against the smallest scoped-VMEM budget (v7x) explicitly.
            vmem_limit_bytes=32 * 1024 * 1024,
            # Let XLA fuse the wrapper transpose into the first operand.
            allow_input_fusion=[True, False, False],
        ),
    )(xt, w32, b32)


if __name__ == "__main__":
    key = jax.random.PRNGKey(0)
    kx, kw, kb = jax.random.split(key, 3)

    # Shapes from the PyTorch module: x1 = randn(1, 2, 2), Linear(2, 2).
    B, S, Fin, Fout = 1, 2, 2, 2

    # Deterministic "Linear(2, 2)" parameters (PyTorch-style uniform init range).
    bound = 1.0 / (Fin ** 0.5)
    w = jax.random.uniform(kw, (Fout, Fin), jnp.float32, -bound, bound)
    b = jax.random.uniform(kb, (Fout,), jnp.float32, -bound, bound)

    x = jax.random.normal(kx, (B, S, Fin), jnp.float32)

    fwd = jax.jit(linear_then_permute)  # jit so the operand transpose can fuse
    out = fwd(x, w, b)
    jax.block_until_ready(out)

    # Reference check (plain JAX): (x @ W^T + b).transpose(0, 2, 1)
    ref = jnp.transpose(jnp.einsum("bsf,of->bso", x, w) + b, (0, 2, 1))
    assert out.shape == (B, Fout, S)
    assert jnp.allclose(out, ref, atol=1e-5, rtol=1e-5), "mismatch vs reference"

    print("KERNEL_OK")
</pallas_src>

<mosaic_0001>
module attributes {stable_mosaic.version = 11 : i64} {
  func.func @linear_permute_kernel(%arg0: i32, %arg1: i32, %arg2: memref<1x2x2xf32, #tpu.memory_space<vmem>>, %arg3: memref<2x2xf32, #tpu.memory_space<smem>>, %arg4: memref<2xf32, #tpu.memory_space<smem>>, %arg5: memref<1x2x2xf32, #tpu.memory_space<vmem>>) attributes {dimension_semantics = [#tpu.dimension_semantics<parallel>, #tpu.dimension_semantics<parallel>], iteration_bounds = array<i64: 1, 1>, scalar_prefetch = 0 : i64, scratch_operands = 0 : i64, tpu.core_type = #tpu.core_type<tc>, window_params = [{transform_indices = @transform_0, window_bounds = array<i64: 1, 2, 2>}, {transform_indices = @transform_1, window_bounds = array<i64: 2, 2>}, {transform_indices = @transform_2, window_bounds = array<i64: 2>}, {transform_indices = @transform_3, window_bounds = array<i64: 1, 2, 2>}]} {
    %c0 = arith.constant 0 : index
    %c0_0 = arith.constant 0 : index
    %c0_1 = arith.constant 0 : index
    %0 = vector.load %arg2[%c0, %c0_0, %c0_1] : memref<1x2x2xf32, #tpu.memory_space<vmem>>, vector<1x2x2xf32>
    %1 = vector.shape_cast %0 : vector<1x2x2xf32> to vector<2x2xf32>
    %c0_2 = arith.constant 0 : index
    %c0_3 = arith.constant 0 : index
    %2 = memref.load %arg3[%c0_2, %c0_3] : memref<2x2xf32, #tpu.memory_space<smem>>
    %3 = vector.extract_strided_slice %1 {offsets = [0, 0], sizes = [1, 2], strides = [1, 1]} : vector<2x2xf32> to vector<1x2xf32>
    %4 = vector.broadcast %2 : f32 to vector<1x2xf32>
    %5 = arith.mulf %4, %3 : vector<1x2xf32>
    %c0_4 = arith.constant 0 : index
    %c1 = arith.constant 1 : index
    %6 = memref.load %arg3[%c0_4, %c1] : memref<2x2xf32, #tpu.memory_space<smem>>
    %7 = vector.extract_strided_slice %1 {offsets = [1, 0], sizes = [1, 2], strides = [1, 1]} : vector<2x2xf32> to vector<1x2xf32>
    %8 = vector.broadcast %6 : f32 to vector<1x2xf32>
    %9 = arith.mulf %8, %7 : vector<1x2xf32>
    %10 = arith.addf %5, %9 : vector<1x2xf32>
    %c0_5 = arith.constant 0 : index
    %11 = memref.load %arg4[%c0_5] : memref<2xf32, #tpu.memory_space<smem>>
    %12 = vector.broadcast %11 : f32 to vector<1x2xf32>
    %13 = arith.addf %10, %12 : vector<1x2xf32>
    %c0_6 = arith.constant 0 : index
    %c0_7 = arith.constant 0 : index
    %c0_8 = arith.constant 0 : index
    %14 = vector.load %arg5[%c0_6, %c0_7, %c0_8] : memref<1x2x2xf32, #tpu.memory_space<vmem>>, vector<1x1x2xf32>
    %15 = vector.shape_cast %14 : vector<1x1x2xf32> to vector<1x2xf32>
    %16 = vector.shape_cast %13 : vector<1x2xf32> to vector<1x1x2xf32>
    tpu.vector_store %arg5[%c0_6, %c0_7, %c0_8], %16 {strides = array<i32>} : memref<1x2x2xf32, #tpu.memory_space<vmem>>, vector<1x1x2xf32>,
    %c1_9 = arith.constant 1 : index
    %c0_10 = arith.constant 0 : index
    %17 = memref.load %arg3[%c1_9, %c0_10] : memref<2x2xf32, #tpu.memory_space<smem>>
    %18 = vector.extract_strided_slice %1 {offsets = [0, 0], sizes = [1, 2], strides = [1, 1]} : vector<2x2xf32> to vector<1x2xf32>
    %19 = vector.broadcast %17 : f32 to vector<1x2xf32>
    %20 = arith.mulf %19, %18 : vector<1x2xf32>
    %c1_11 = arith.constant 1 : index
    %c1_12 = arith.constant 1 : index
    %21 = memref.load %arg3[%c1_11, %c1_12] : memref<2x2xf32, #tpu.memory_space<smem>>
    %22 = vector.extract_strided_slice %1 {offsets = [1, 0], sizes = [1, 2], strides = [1, 1]} : vector<2x2xf32> to vector<1x2xf32>
    %23 = vector.broadcast %21 : f32 to vector<1x2xf32>
    %24 = arith.mulf %23, %22 : vector<1x2xf32>
    %25 = arith.addf %20, %24 : vector<1x2xf32>
    %c1_13 = arith.constant 1 : index
    %26 = memref.load %arg4[%c1_13] : memref<2xf32, #tpu.memory_space<smem>>
    %27 = vector.broadcast %26 : f32 to vector<1x2xf32>
    %28 = arith.addf %25, %27 : vector<1x2xf32>
    %c0_14 = arith.constant 0 : index
    %c1_15 = arith.constant 1 : index
    %c0_16 = arith.constant 0 : index
    %29 = vector.load %arg5[%c0_14, %c1_15, %c0_16] : memref<1x2x2xf32, #tpu.memory_space<vmem>>, vector<1x1x2xf32>
    %30 = vector.shape_cast %29 : vector<1x1x2xf32> to vector<1x2xf32>
    %31 = vector.shape_cast %28 : vector<1x2xf32> to vector<1x1x2xf32>
    tpu.vector_store %arg5[%c0_14, %c1_15, %c0_16], %31 {strides = array<i32>} : memref<1x2x2xf32, #tpu.memory_space<vmem>>, vector<1x1x2xf32>,
    return
  }
  func.func @transform_0(%arg0: i32, %arg1: i32) -> (i32, i32, i32) {
    %c0_i32 = arith.constant 0 : i32
    %c0_i32_0 = arith.constant 0 : i32
    return %arg0, %c0_i32, %arg1 : i32, i32, i32
  }
  func.func @transform_1(%arg0: i32, %arg1: i32) -> (i32, i32) {
    %c0_i32 = arith.constant 0 : i32
    %c0_i32_0 = arith.constant 0 : i32
    %c0_i32_1 = arith.constant 0 : i32
    return %c0_i32, %c0_i32_0 : i32, i32
  }
  func.func @transform_2(%arg0: i32, %arg1: i32) -> i32 {
    %c0_i32 = arith.constant 0 : i32
    %c0_i32_0 = arith.constant 0 : i32
    return %c0_i32 : i32
  }
  func.func @transform_3(%arg0: i32, %arg1: i32) -> (i32, i32, i32) {
    %c0_i32 = arith.constant 0 : i32
    %c0_i32_0 = arith.constant 0 : i32
    return %arg0, %c0_i32, %arg1 : i32, i32, i32
  }
}

</mosaic_0001>

<bundles_post_ra>
// kernel: linear_then_permute.2
= control target key start
LH: loop header
LB: loop body
LE: loop exit
PB: predicated region body
PF: predicated region fallthrough
CT: control target
= control target key end

     0   :  { %8 = vsyncpa [#allocation4], 0  ;;  %s182_s0 = inlined_call_operand.vmem [shape: f32[2,2], index: 0, kind: input, shape index: {}]   ;;  %s183_s1 = inlined_call_operand.vmem [shape: f32[2], index: 1, kind: input, shape index: {}]   ;;  %s184_s2 = inlined_call_operand.vmem [shape: f32[1,2,2], index: 2, kind: input, shape index: {}]   ;;  %s185_s3 = inlined_call_operand.hbm [shape: f32[1,2,2], index: 3, kind: output, shape index: {}]  }
   0x1   :  { %9 = vsyncpa [#allocation6], 0 }
   0x2   :  { %10 = vsyncpa [#allocation3], 0  ;;  %s19_s14 = sshll.u32 %s182_s0, 4  ;;  %s29_s17 = sshll.u32 %s183_s1, 4  ;;  %s20_s14 = int_to_ptr.vmem [resolvable:$true] %s19_s14  ;;  %s30_s17 = int_to_ptr.vmem [resolvable:$true] %s29_s17 }
   0x3   :  { %s97_s18 = scalar_lea.vmem %s20_s14, 32  ;;  %p102_p1 = scmp.lt.s32.totalorder %s20_s14, %s20_s14 }
   0x4   :  { %p98_p0 = scmp.ne.s32.totalorder %s20_s14, %s97_s18  ;;  %p103_p2 = scmp.lt.s32.totalorder %s97_s18, %s97_s18 }
   0x6   :  { %p104_p3 = por %p103_p2, %p102_p1 }
   0x8   :  { %p105_p4 = pnand %p104_p3, %p98_p0 }
   0xa   :  { %108 = shalt.err (!%p105_p4)
}
   0xb   :  { %s147_s19 = smov [#allocation2]   ;;  %s109_s20 = scalar_lea.vmem %s30_s17, 16 }
   0xc   :  { %22 = dma.vmem_to_smem %s20_s14, 32, %s147_s19, [#allocation4]  }
   0xd   :  { %p110_p5 = scmp.ne.s32.totalorder %s30_s17, %s109_s20  ;;  %p114_p6 = scmp.lt.s32.totalorder %s30_s17, %s30_s17 }
   0xe   :  { %p115_p7 = scmp.lt.s32.totalorder %s109_s20, %s109_s20 }
  0x10   :  { %p116_p8 = por %p115_p7, %p114_p6 }
  0x12   :  { %p117_p9 = pnand %p116_p8, %p110_p5 }
  0x14   :  { %120 = shalt.err (!%p117_p9)
}
  0x15   :  { %s148_s0 = smov [#allocation5]  }
  0x16   :  { %32 = dma.vmem_to_smem %s30_s17, 16, %s148_s0, [#allocation6]  }
  0x17   :  { %141 = dma.done.wait [#allocation4], 32  }
  0x18   :  { %142 = vsyncadd [#allocation4], 4294967264 }
  0x19   :  { %143 = dma.done.wait [#allocation6], 16  }
  0x1a   :  { %144 = vsyncadd [#allocation6], 4294967280 }
  0x1b   :  { %39 = sfence }
  0x1c   :  { %v40_v0 = vld [vmem:[%s184_s2] sm:$0x3]  ;;  %s45_s22 = sld [smem:[#allocation2]]  ;;  %vm58_vm0 = vcmask 8192   ;;  %s149_s2 = smov [#allocation7]  }
  0x1d   :  { %43 = vst [vmem:[#allocation8] sm:$0x3] %v40_v0  ;;  %s90_s23 = sld [smem:[#allocation2 + $0x1]]  ;;  %s80_s28 = sshll.u32 %s149_s2, 4  ;;  %s81_s28 = int_to_ptr.vmem [resolvable:$true] %s80_s28 }
  0x1e   :  { %s55_s24 = sld [smem:[#allocation5]]  ;;  %s121_s29 = scalar_lea.vmem %s81_s28, 32 }
  0x1f   :  { %s91_s25 = sld [smem:[#allocation2 + $0x80]]  ;;  %p122_p10 = scmp.ne.s32.totalorder %s81_s28, %s121_s29 }
  0x20   :  { %s92_s26 = sld [smem:[#allocation2 + $0x81]]  ;;  %p126_p11 = scmp.lt.s32.totalorder %s81_s28, %s81_s28 }
  0x21   :  { %s93_s27 = sld [smem:[#allocation5 + $0x1]]  ;;  %p127_p12 = scmp.lt.s32.totalorder %s121_s29, %s121_s29 }
  0x22   :  { %v46_v1 = vstv %s45_s22 }
  0x23   :  { %v49_v2 = vstv %s90_s23  ;;  %p128_p13 = por %p127_p12, %p126_p11 }
  0x24   :  { %v44_v3 = vld [vmem:[#allocation8] sm:$0x3]  ;;  %v56_v11 = vstv %s55_s24 }
  0x25   :  { %v47_v4 = vmul.f32 %v46_v1, %v44_v3  ;;  %v50_v5 = vmul.f32 %v49_v2, %v44_v3  ;;  %v61_v6 = vstv %s91_s25  ;;  %p129_p0 = pnand %p128_p13, %p122_p10 }
  0x26   :  { %v64_v7 = vstv %s92_s26  ;;  %v62_v9 = vmul.f32 %v61_v6, %v44_v3 }
  0x27   :  { %v52_v8 = vrot.slane %v50_v5, 1  ;;  %v65_v10 = vmul.f32 %v64_v7, %v44_v3  ;;  %v71_v14 = vstv %s93_s27 }
  0x29   :  { %v54_v12 = vadd.f32 %v52_v8, %v47_v4  ;;  %v67_v13 = vrot.slane %v65_v10, 1 }
  0x2b   :  { %v57_v15 = vadd.f32 %v56_v11, %v54_v12  ;;  %v69_v16 = vadd.f32 %v67_v13, %v62_v9 }
  0x2d   :  { %59 = vst.msk [vmem:[#allocation7] sm:$0x1] %vm58_vm0, %v57_v15  ;;  %v72_v17 = vadd.f32 %v71_v14, %v69_v16 }
  0x2f   :  { %73 = vst.msk [vmem:[#allocation7 + $0x1] sm:$0x1] %vm58_vm0, %v72_v17 }
  0x30   :  { %132 = shalt.err (!%p129_p0)
}
  0x31   :  { %83 = dma.vmem_to_hbm [thread:$0]  %s81_s28, 32, %s185_s3, [#allocation3]  }
  0x32   :  { %145 = dma.done.wait [#allocation3], 32  }
  0x33   :  { %146 = vsyncadd [#allocation3], 4294967264 }
  0x34   :  { %87 = vsyncpa [#allocation3], 1 }
  0x35   :  { %88 = vsyncpa [#allocation4], 1 }
  0x36   :  { %89 = vsyncpa [#allocation6], 1 }

</bundles_post_ra>
